<compile_context>
chip_gen: v7x
topology: tpu7x:2x2x1
jax: 0.10.0
libtpu: 0.0.40
codegen_flags: <defaults>
</compile_context>

<pallas_src>
import functools

import jax
import jax.numpy as jnp
from jax.experimental import pallas as pl
from jax.experimental.pallas import tpu as pltpu


def _round_up(a, m):
    return ((a + m - 1) // m) * m


def _softplus(x):
    # numerically-stable softplus: max(x,0) + log1p(exp(-|x|))
    return jnp.maximum(x, 0.0) + jnp.log1p(jnp.exp(-jnp.abs(x)))


def encoder_kernel(x_ref,
                   w1_ref, b1_ref,
                   w2_ref, b2_ref,
                   wh_ref, bh_ref,
                   out_ref,
                   *, z_dim):
    # shared[0]: Linear(x_dim, Hp) + ReLU   (bf16 MXU, f32 accumulate)
    h1 = jnp.dot(x_ref[...], w1_ref[...],
                 preferred_element_type=jnp.float32) + b1_ref[...]
    h1 = jnp.maximum(h1, 0.0).astype(jnp.bfloat16)

    # shared[2]: Linear(Hp, Hp) + ReLU
    h2 = jnp.dot(h1, w2_ref[...],
                 preferred_element_type=jnp.float32) + b2_ref[...]
    h2 = jnp.maximum(h2, 0.0).astype(jnp.bfloat16)

    # fused heads (output padded to a 128-lane multiple):
    #   columns [0:z)    = mu            (identity)
    #   columns [z:...)  = sigma / pad   (softplus; pad lanes are sliced off
    #                                     in the wrapper)
    head = jnp.dot(h2, wh_ref[...],
                   preferred_element_type=jnp.float32) + bh_ref[...]
    lane = jax.lax.broadcasted_iota(jnp.int32, head.shape, dimension=1)
    out = jnp.where(lane < z_dim, head, _softplus(head))
    out_ref[...] = out.astype(out_ref.dtype)


def encoder_forward(x, params, *, batch_tile=256):
    """Whole Encoder forward in one Pallas kernel, tiled over (padded) batch."""
    w1, b1, w2, b2, wmu, bmu, wsig, bsig = params
    B, x_dim = x.shape
    H = w1.shape[1]
    z_dim = wmu.shape[1]
    Hp = _round_up(H, 128)           # 500 -> 512: clean (8,128) layouts
    Zp = _round_up(2 * z_dim, 128)   # lane-dense, unmasked output stores

    # --- zero-pad hidden / head dims (numerically inert through the chain) ---
    w1p = jnp.zeros((x_dim, Hp), jnp.float32).at[:, :H].set(w1)
    b1p = jnp.zeros((1, Hp), jnp.float32).at[:, :H].set(b1.reshape(1, H))
    w2p = jnp.zeros((Hp, Hp), jnp.float32).at[:H, :H].set(w2)
    b2p = jnp.zeros((1, Hp), jnp.float32).at[:, :H].set(b2.reshape(1, H))
    # fused [mu | sigma | pad] head: one matmul, one lane-dense output slab
    whp = (jnp.zeros((Hp, Zp), jnp.float32)
           .at[:H, :z_dim].set(wmu)
           .at[:H, z_dim:2 * z_dim].set(wsig))
    bhp = (jnp.zeros((1, Zp), jnp.float32)
           .at[0, :z_dim].set(bmu)
           .at[0, z_dim:2 * z_dim].set(bsig))

    # bf16 operands for the MXU (accumulation stays f32 inside the kernel)
    x_bf = x.astype(jnp.bfloat16)
    w1p = w1p.astype(jnp.bfloat16)
    w2p = w2p.astype(jnp.bfloat16)
    whp = whp.astype(jnp.bfloat16)

    # --- batch tiling: big tile, shrink for tiny batches, pad to a multiple ---
    bt = _round_up(min(batch_tile, _round_up(B, 8)), 8)
    Bp = _round_up(B, bt)
    if Bp != B:
        x_bf = jnp.zeros((Bp, x_dim), jnp.bfloat16).at[:B].set(x_bf)

    grid = (Bp // bt,)
    resident = lambda shape: pl.BlockSpec(shape, lambda i: (0, 0))

    kernel = functools.partial(encoder_kernel, z_dim=z_dim)

    out = pl.pallas_call(
        kernel,
        out_shape=jax.ShapeDtypeStruct((Bp, Zp), jnp.float32),
        grid_spec=pltpu.PrefetchScalarGridSpec(
            num_scalar_prefetch=0,
            grid=grid,
            in_specs=[
                pl.BlockSpec((bt, x_dim), lambda i: (i, 0)),   # x tile
                resident((x_dim, Hp)), resident((1, Hp)),      # Linear 1
                resident((Hp, Hp)),    resident((1, Hp)),      # Linear 2
                resident((Hp, Zp)),    resident((1, Zp)),      # fused mu|sigma head
            ],
            out_specs=pl.BlockSpec((bt, Zp), lambda i: (i, 0)),
        ),
        compiler_params=pltpu.CompilerParams(
            # batch axis is independent -> shards across TensorCores (megacore)
            dimension_semantics=("parallel",),
        ),
    )(x_bf, w1p, b1p, w2p, b2p, whp, bhp)

    mu = out[:B, :z_dim]
    sigma = out[:B, z_dim:2 * z_dim]
    return mu, sigma


def init_params(key, x_dim, z_dim, hidden=500):
    ks = jax.random.split(key, 8)

    def lin(kw, kb, fan_in, fan_out):
        scale = 1.0 / jnp.sqrt(fan_in)
        w = jax.random.uniform(kw, (fan_in, fan_out), jnp.float32, -scale, scale)
        b = jax.random.uniform(kb, (fan_out,), jnp.float32, -scale, scale)
        return w, b

    w1, b1 = lin(ks[0], ks[1], x_dim, hidden)
    w2, b2 = lin(ks[2], ks[3], hidden, hidden)
    wmu, bmu = lin(ks[4], ks[5], hidden, z_dim)
    wsig, bsig = lin(ks[6], ks[7], hidden, z_dim)
    return (w1, b1, w2, b2, wmu, bmu, wsig, bsig)


def encoder_reference(x, params):
    w1, b1, w2, b2, wmu, bmu, wsig, bsig = params
    h = jnp.maximum(x @ w1 + b1, 0.0)
    h = jnp.maximum(h @ w2 + b2, 0.0)
    mu = h @ wmu + bmu
    sigma = jax.nn.softplus(h @ wsig + bsig)
    return mu, sigma


if __name__ == "__main__":
    key = jax.random.PRNGKey(0)
    kx, kp = jax.random.split(key)

    batch, x_dim, z_dim = 8, 32, 8
    x = jax.random.normal(kx, (batch, x_dim), jnp.float32)
    params = init_params(kp, x_dim, z_dim)

    mu, sigma = encoder_forward(x, params)
    mu, sigma = jax.block_until_ready((mu, sigma))

    mu_ref, sigma_ref = encoder_reference(x, params)
    assert mu.shape == (batch, z_dim) and sigma.shape == (batch, z_dim)
    assert bool(jnp.all(sigma > 0.0))
    # bf16 MXU operands with f32 accumulation -> compare to the f32 reference
    # with a bf16-appropriate tolerance.
    assert jnp.allclose(mu, mu_ref, atol=5e-2, rtol=5e-2)
    assert jnp.allclose(sigma, sigma_ref, atol=5e-2, rtol=5e-2)

    # TODO(synk): torch.distributions.Independent(Normal(...), 1) has no Pallas
    # equivalent; the kernel returns its parameters (mu, sigma) instead.
    print("KERNEL_OK")
</pallas_src>

<mosaic_0001>
module attributes {stable_mosaic.version = 11 : i64} {
  func.func @encoder_kernel(%arg0: i32, %arg1: memref<8x32xbf16, #tpu.memory_space<vmem>>, %arg2: memref<32x512xbf16, #tpu.memory_space<vmem>>, %arg3: memref<1x512xf32, #tpu.memory_space<vmem>>, %arg4: memref<512x512xbf16, #tpu.memory_space<vmem>>, %arg5: memref<1x512xf32, #tpu.memory_space<vmem>>, %arg6: memref<512x128xbf16, #tpu.memory_space<vmem>>, %arg7: memref<1x128xf32, #tpu.memory_space<vmem>>, %arg8: memref<8x128xf32, #tpu.memory_space<vmem>>) attributes {dimension_semantics = [#tpu.dimension_semantics<parallel>], iteration_bounds = array<i64: 1>, scalar_prefetch = 0 : i64, scratch_operands = 0 : i64, tpu.core_type = #tpu.core_type<tc>, window_params = [{transform_indices = @transform_0, window_bounds = array<i64: 8, 32>}, {pipeline_mode = #tpu.pipeline_mode<synchronous>, transform_indices = @transform_1, window_bounds = array<i64: 32, 512>}, {pipeline_mode = #tpu.pipeline_mode<synchronous>, transform_indices = @transform_2, window_bounds = array<i64: 1, 512>}, {pipeline_mode = #tpu.pipeline_mode<synchronous>, transform_indices = @transform_3, window_bounds = array<i64: 512, 512>}, {pipeline_mode = #tpu.pipeline_mode<synchronous>, transform_indices = @transform_4, window_bounds = array<i64: 1, 512>}, {pipeline_mode = #tpu.pipeline_mode<synchronous>, transform_indices = @transform_5, window_bounds = array<i64: 512, 128>}, {pipeline_mode = #tpu.pipeline_mode<synchronous>, transform_indices = @transform_6, window_bounds = array<i64: 1, 128>}, {transform_indices = @transform_7, window_bounds = array<i64: 8, 128>}]} {
    %c0 = arith.constant 0 : index
    %c0_0 = arith.constant 0 : index
    %0 = vector.load %arg1[%c0, %c0_0] : memref<8x32xbf16, #tpu.memory_space<vmem>>, vector<8x32xbf16>
    %c0_1 = arith.constant 0 : index
    %c0_2 = arith.constant 0 : index
    %1 = vector.load %arg2[%c0_1, %c0_2] : memref<32x512xbf16, #tpu.memory_space<vmem>>, vector<32x512xbf16>
    %cst = arith.constant dense<0.000000e+00> : vector<8x512xf32>
    %2 = tpu.matmul %0, %1, %cst {dimension_numbers = #tpu.dot_dimension_numbers<[1], [0], [0], [1], [0, 0, 1, 1], [], []>} : vector<8x32xbf16>, vector<32x512xbf16>, vector<8x512xf32> -> vector<8x512xf32>
    %c0_3 = arith.constant 0 : index
    %c0_4 = arith.constant 0 : index
    %3 = vector.load %arg3[%c0_3, %c0_4] : memref<1x512xf32, #tpu.memory_space<vmem>>, vector<1x512xf32>
    %4 = vector.broadcast %3 : vector<1x512xf32> to vector<8x512xf32>
    %5 = arith.addf %2, %4 : vector<8x512xf32>
    %cst_5 = arith.constant 0.000000e+00 : f32
    %6 = vector.broadcast %cst_5 : f32 to vector<8x512xf32>
    %7 = arith.maximumf %5, %6 : vector<8x512xf32>
    %8 = arith.truncf %7 : vector<8x512xf32> to vector<8x512xbf16>
    %c0_6 = arith.constant 0 : index
    %c0_7 = arith.constant 0 : index
    %9 = vector.load %arg4[%c0_6, %c0_7] : memref<512x512xbf16, #tpu.memory_space<vmem>>, vector<512x512xbf16>
    %cst_8 = arith.constant dense<0.000000e+00> : vector<8x512xf32>
    %10 = tpu.matmul %8, %9, %cst_8 {dimension_numbers = #tpu.dot_dimension_numbers<[1], [0], [0], [1], [0, 0, 1, 1], [], []>} : vector<8x512xbf16>, vector<512x512xbf16>, vector<8x512xf32> -> vector<8x512xf32>
    %c0_9 = arith.constant 0 : index
    %c0_10 = arith.constant 0 : index
    %11 = vector.load %arg5[%c0_9, %c0_10] : memref<1x512xf32, #tpu.memory_space<vmem>>, vector<1x512xf32>
    %12 = vector.broadcast %11 : vector<1x512xf32> to vector<8x512xf32>
    %13 = arith.addf %10, %12 : vector<8x512xf32>
    %cst_11 = arith.constant 0.000000e+00 : f32
    %14 = vector.broadcast %cst_11 : f32 to vector<8x512xf32>
    %15 = arith.maximumf %13, %14 : vector<8x512xf32>
    %16 = arith.truncf %15 : vector<8x512xf32> to vector<8x512xbf16>
    %c0_12 = arith.constant 0 : index
    %c0_13 = arith.constant 0 : index
    %17 = vector.load %arg6[%c0_12, %c0_13] : memref<512x128xbf16, #tpu.memory_space<vmem>>, vector<512x128xbf16>
    %cst_14 = arith.constant dense<0.000000e+00> : vector<8x128xf32>
    %18 = tpu.matmul %16, %17, %cst_14 {dimension_numbers = #tpu.dot_dimension_numbers<[1], [0], [0], [1], [0, 0, 1, 1], [], []>} : vector<8x512xbf16>, vector<512x128xbf16>, vector<8x128xf32> -> vector<8x128xf32>
    %c0_15 = arith.constant 0 : index
    %c0_16 = arith.constant 0 : index
    %19 = vector.load %arg7[%c0_15, %c0_16] : memref<1x128xf32, #tpu.memory_space<vmem>>, vector<1x128xf32>
    %20 = vector.broadcast %19 : vector<1x128xf32> to vector<8x128xf32>
    %21 = arith.addf %18, %20 : vector<8x128xf32>
    %22 = tpu.iota {dimensions = array<i32: 1>} : vector<8x128xi32>
    %c8_i32 = arith.constant 8 : i32
    %23 = vector.broadcast %c8_i32 : i32 to vector<8x128xi32>
    %24 = arith.cmpi slt, %22, %23 : vector<8x128xi32>
    %cst_17 = arith.constant 0.000000e+00 : f32
    %25 = vector.broadcast %cst_17 : f32 to vector<8x128xf32>
    %26 = arith.maximumf %21, %25 : vector<8x128xf32>
    %27 = math.absf %21 : vector<8x128xf32>
    %cst_18 = arith.constant 0.000000e+00 : f32
    %28 = vector.broadcast %cst_18 : f32 to vector<8x128xf32>
    %29 = arith.subf %28, %27 : vector<8x128xf32>
    %30 = math.exp %29 : vector<8x128xf32>
    %31 = math.log1p %30 : vector<8x128xf32>
    %32 = arith.addf %26, %31 : vector<8x128xf32>
    %33 = arith.select %24, %21, %32 : vector<8x128xi1>, vector<8x128xf32>
    %c0_19 = arith.constant 0 : index
    %c0_20 = arith.constant 0 : index
    %34 = vector.load %arg8[%c0_19, %c0_20] : memref<8x128xf32, #tpu.memory_space<vmem>>, vector<8x128xf32>
    tpu.vector_store %arg8[%c0_19, %c0_20], %33 {strides = array<i32>} : memref<8x128xf32, #tpu.memory_space<vmem>>, vector<8x128xf32>,
    return
  }
  func.func @transform_0(%arg0: i32) -> (i32, i32) {
    %c0_i32 = arith.constant 0 : i32
    %c0_i32_0 = arith.constant 0 : i32
    return %arg0, %c0_i32 : i32, i32
  }
  func.func @transform_1(%arg0: i32) -> (i32, i32) {
    %c0_i32 = arith.constant 0 : i32
    %c0_i32_0 = arith.constant 0 : i32
    %c0_i32_1 = arith.constant 0 : i32
    return %c0_i32, %c0_i32_0 : i32, i32
  }
  func.func @transform_2(%arg0: i32) -> (i32, i32) {
    %c0_i32 = arith.constant 0 : i32
    %c0_i32_0 = arith.constant 0 : i32
    %c0_i32_1 = arith.constant 0 : i32
    return %c0_i32, %c0_i32_0 : i32, i32
  }
  func.func @transform_3(%arg0: i32) -> (i32, i32) {
    %c0_i32 = arith.constant 0 : i32
    %c0_i32_0 = arith.constant 0 : i32
    %c0_i32_1 = arith.constant 0 : i32
    return %c0_i32, %c0_i32_0 : i32, i32
  }
  func.func @transform_4(%arg0: i32) -> (i32, i32) {
    %c0_i32 = arith.constant 0 : i32
    %c0_i32_0 = arith.constant 0 : i32
    %c0_i32_1 = arith.constant 0 : i32
    return %c0_i32, %c0_i32_0 : i32, i32
  }
  func.func @transform_5(%arg0: i32) -> (i32, i32) {
    %c0_i32 = arith.constant 0 : i32
    %c0_i32_0 = arith.constant 0 : i32
    %c0_i32_1 = arith.constant 0 : i32
    return %c0_i32, %c0_i32_0 : i32, i32
  }
  func.func @transform_6(%arg0: i32) -> (i32, i32) {
    %c0_i32 = arith.constant 0 : i32
    %c0_i32_0 = arith.constant 0 : i32
    %c0_i32_1 = arith.constant 0 : i32
    return %c0_i32, %c0_i32_0 : i32, i32
  }
  func.func @transform_7(%arg0: i32) -> (i32, i32) {
    %c0_i32 = arith.constant 0 : i32
    %c0_i32_0 = arith.constant 0 : i32
    return %arg0, %c0_i32 : i32, i32
  }
}

</mosaic_0001>

<bundles_post_ra>
// kernel: tpu_custom_call.1
= control target key start
LH: loop header
LB: loop body
LE: loop exit
PB: predicated region body
PF: predicated region fallthrough
CT: control target
= control target key end

     0   :  { %12 = vsyncpa [#allocation3], 0  ;;  %s2341_s0 = inlined_call_operand.hbm [shape: bf16[8,32], index: 0, kind: input, shape index: {}]   ;;  %s2342_s1 = inlined_call_operand.hbm [shape: bf16[32,512], index: 1, kind: input, shape index: {}]   ;;  %s2343_s2 = inlined_call_operand.vmem [shape: f32[1,512], index: 2, kind: input, shape index: {}]   ;;  %s2344_s3 = inlined_call_operand.hbm [shape: bf16[512,512], index: 3, kind: input, shape index: {}]   ;;  %s2345_s4 = inlined_call_operand.vmem [shape: f32[1,512], index: 4, kind: input, shape index: {}]   ;;  %s2346_s5 = inlined_call_operand.hbm [shape: bf16[512,128], index: 5, kind: input, shape index: {}]   ;;  %s2347_s6 = inlined_call_operand.vmem [shape: f32[1,128], index: 6, kind: input, shape index: {}]   ;;  %s2348_s7 = inlined_call_operand.hbm [shape: f32[8,128], index: 7, kind: output, shape index: {}]  }
   0x1   :  { %13 = vsyncpa [#allocation6], 0 }
   0x2   :  { %14 = vsyncpa [#allocation9], 0 }
   0x3   :  { %15 = vsyncpa [#allocation4], 0  ;;  %s2183_s24 = smov [#allocation5]   ;;  %s2065_s28 = scalar_lea.hbm %s2342_s1, 1024 }
   0x4   :  { %s31_s25 = sshll.u32 %s2183_s24, 4  ;;  %p2066_p0 = scmp.ne.s32.totalorder %s2342_s1, %s2065_s28  ;;  %s32_s25 = int_to_ptr.vmem [resolvable:$true] %s31_s25 }
   0x5   :  { %p2069_p1 = scmp.lt.u32.totalorder %s2065_s28, %s2342_s1 }
   0x7   :  { %p2071_p2 = pnand %p2069_p1, %p2066_p0 }
   0x9   :  { %2074 = shalt.err (!%p2071_p2)
}
   0xa   :  { %s2075_s10 = scalar_lea.vmem %s32_s25, 1024  ;;  %p2080_p4 = scmp.lt.s32.totalorder %s32_s25, %s32_s25 }
   0xb   :  { %p2076_p3 = scmp.ne.s32.totalorder %s32_s25, %s2075_s10  ;;  %p2081_p5 = scmp.lt.s32.totalorder %s2075_s10, %s2075_s10 }
   0xd   :  { %p2082_p6 = por %p2081_p5, %p2080_p4 }
   0xf   :  { %p2083_p7 = pnand %p2082_p6, %p2076_p3 }
  0x11   :  { %2086 = shalt.err (!%p2083_p7)
}
  0x12   :  { %s2184_s11 = smov 256   ;;  %s2185_s12 = smov 16  }
  0x13   :  { %37 = dma.hbm_to_vmem [thread:$0]  %s2342_s1, 1024, %s32_s25, [#allocation6], %s2184_s11, %s2184_s11, %s2185_s12  }
  0x14   :  { %s2186_s15 = smov [#allocation2]   ;;  %s2187_s17 = smov [#allocation7]  }
  0x15   :  { %s22_s16 = sshll.u32 %s2186_s15, 4  ;;  %s45_s18 = sshll.u32 %s2187_s17, 4  ;;  %s23_s16 = int_to_ptr.vmem [resolvable:$true] %s22_s16  ;;  %s46_s18 = int_to_ptr.vmem [resolvable:$true] %s45_s18 }
  0x16   :  { %s2087_s21 = scalar_lea.hbm %s2341_s0, 64 }
  0x17   :  { %p2088_p8 = scmp.ne.s32.totalorder %s2341_s0, %s2087_s21  ;;  %p2091_p9 = scmp.lt.u32.totalorder %s2087_s21, %s2341_s0 }
  0x19   :  { %p2093_p10 = pnand %p2091_p9, %p2088_p8 }
  0x1b   :  { %2096 = shalt.err (!%p2093_p10)
}
  0x1c   :  { %s2097_s1 = scalar_lea.vmem %s23_s16, 64  ;;  %p2102_p12 = scmp.lt.s32.totalorder %s23_s16, %s23_s16 }
  0x1d   :  { %p2098_p11 = scmp.ne.s32.totalorder %s23_s16, %s2097_s1  ;;  %p2103_p13 = scmp.lt.s32.totalorder %s2097_s1, %s2097_s1 }
  0x1f   :  { %p2104_p0 = por %p2103_p13, %p2102_p12 }
  0x21   :  { %p2105_p1 = pnand %p2104_p0, %p2098_p11 }
  0x23   :  { %2108 = shalt.err (!%p2105_p1)
}
  0x24   :  { %25 = dma.hbm_to_vmem [thread:$0]  %s2341_s0, 64, %s23_s16, [#allocation3]  }
  0x25   :  { %s2109_s30 = scalar_lea.hbm %s2344_s3, 16384 }
  0x26   :  { %p2110_p2 = scmp.ne.s32.totalorder %s2344_s3, %s2109_s30  ;;  %p2113_p3 = scmp.lt.u32.totalorder %s2109_s30, %s2344_s3 }
  0x28   :  { %p2115_p4 = pnand %p2113_p3, %p2110_p2 }
  0x2a   :  { %2118 = shalt.err (!%p2115_p4)
}
  0x2b   :  { %s2119_s14 = scalar_lea.vmem %s46_s18, 16384  ;;  %p2124_p6 = scmp.lt.s32.totalorder %s46_s18, %s46_s18 }
  0x2c   :  { %p2120_p5 = scmp.ne.s32.totalorder %s46_s18, %s2119_s14  ;;  %p2125_p7 = scmp.lt.s32.totalorder %s2119_s14, %s2119_s14 }
  0x2e   :  { %p2126_p8 = por %p2125_p7, %p2124_p6 }
  0x30   :  { %p2127_p9 = pnand %p2126_p8, %p2120_p5 }
  0x32   :  { %2130 = shalt.err (!%p2127_p9)
}
  0x33   :  { %51 = dma.hbm_to_vmem [thread:$0]  %s2344_s3, 16384, %s46_s18, [#allocation6], %s2184_s11, %s2184_s11, %s2185_s12  }
  0x34   :  { %s2188_s16 = smov [#allocation8]   ;;  %s2131_s21 = scalar_lea.hbm %s2346_s5, 4096 }
  0x35   :  { %s59_s17 = sshll.u32 %s2188_s16, 4  ;;  %p2132_p10 = scmp.ne.s32.totalorder %s2346_s5, %s2131_s21  ;;  %s60_s17 = int_to_ptr.vmem [resolvable:$true] %s59_s17 }
  0x36   :  { %p2135_p11 = scmp.lt.u32.totalorder %s2131_s21, %s2346_s5 }
  0x38   :  { %p2137_p12 = pnand %p2135_p11, %p2132_p10 }
  0x3a   :  { %2140 = shalt.err (!%p2137_p12)
}
  0x3b   :  { %s2141_s1 = scalar_lea.vmem %s60_s17, 4096  ;;  %p2146_p0 = scmp.lt.s32.totalorder %s60_s17, %s60_s17 }
  0x3c   :  { %p2142_p13 = scmp.ne.s32.totalorder %s60_s17, %s2141_s1  ;;  %p2147_p1 = scmp.lt.s32.totalorder %s2141_s1, %s2141_s1 }
  0x3e   :  { %p2148_p2 = por %p2147_p1, %p2146_p0 }
  0x40   :  { %p2149_p3 = pnand %p2148_p2, %p2142_p13 }
  0x42   :  { %2152 = shalt.err (!%p2149_p3)
}
  0x43   :  { %s2189_s3 = smov 64   ;;  %s2190_s11 = smov 4  }
  0x44   :  { %65 = dma.hbm_to_vmem [thread:$0]  %s2346_s5, 4096, %s60_s17, [#allocation9], %s2189_s3, %s2189_s3, %s2190_s11  }
  0x45   :  { %2175 = dma.done.wait [#allocation3], 64  }
  0x46   :  { %2176 = vsyncadd [#allocation3], 4294967232 }
  0x47   :  { %2177 = dma.done.wait [#allocation6], 17408  }
  0x48   :  { %2178 = vsyncadd [#allocation6], 4294949888 }
  0x49   :  { %2179 = dma.done.wait [#allocation9], 4096  }
  0x4a   :  { %2180 = vsyncadd [#allocation9], 4294963200  ;;  %v2191_v0 = vmov 0   ;;  %v1825_v1 = vld [vmem:[#allocation5 + $0x4] ss:$16 sps:$4 sm:$0xff]   ;;  %vm152_vm0 = vcmask 261120  }
  0x4b   :  { %188 = vmatprep.mubr.bf16.mxu0 %v2191_v0  ;;  %229 = vmatprep.mubr.bf16.mxu1 %v2191_v0  ;;  %v1827_v2 = vld [vmem:[#allocation5] ss:$16 sps:$4 sm:$0xff]   ;;  %v1828_v3 = vld [vmem:[#allocation5 + $0x24] ss:$16 sps:$4 sm:$0xff]   ;;  %v1831_v5 = vld [vmem:[#allocation5 + $0xc] ss:$16 sps:$4 sm:$0xff]  }
  0x4c   :  { %156 = vmatprep.subr.bf16.mxu0 %v1825_v1  ;;  %v1830_v4 = vld [vmem:[#allocation5 + $0x20] ss:$16 sps:$4 sm:$0xff]   ;;  %v1833_v6 = vld [vmem:[#allocation5 + $0x8] ss:$16 sps:$4 sm:$0xff]   ;;  %v81_v7 = vld [vmem:[#allocation2] sm:$0xf]  ;;  %197 = vmatprep.subr.bf16.mxu1 %v1831_v5 }
  0x4d   :  { %157 = vmatpush1.bf16.msra.mxu0 %v1827_v2  ;;  %v1834_v8 = vld [vmem:[#allocation5 + $0x2c] ss:$16 sps:$4 sm:$0xff]   ;;  %198 = vmatpush1.bf16.msra.mxu1 %v1833_v6  ;;  %v1836_v9 = vld [vmem:[#allocation5 + $0x28] ss:$16 sps:$4 sm:$0xff]   ;;  %v1839_v10 = vld [vmem:[#allocation7 + $0x4] ss:$16 sps:$4 sm:$0xff]  }
  0x4e   :  { %158 = vmatprep.subr.bf16.mxu0 %v1828_v3  ;;  %199 = vmatprep.subr.bf16.mxu1 %v1834_v8  ;;  %v1837_v11 = vld [vmem:[#allocation7] ss:$16 sps:$4 sm:$0xff]   ;;  %v1842_v12 = vld [vmem:[#allocation7 + $0xc] ss:$16 sps:$4 sm:$0xff]   ;;  %v1845_v13 = vld [vmem:[#allocation7 + $0x24] ss:$16 sps:$4 sm:$0xff]  }
  0x4f   :  { %v1840_v14 = vld [vmem:[#allocation7 + $0x8] ss:$16 sps:$4 sm:$0xff]   ;;  %v1843_v15 = vld [vmem:[#allocation7 + $0x20] ss:$16 sps:$4 sm:$0xff]   ;;  %v1848_v16 = vld [vmem:[#allocation7 + $0x2c] ss:$16 sps:$4 sm:$0xff]  }
  0x50   :  { %v1851_v17 = vld [vmem:[#allocation7 + $0x44] ss:$16 sps:$4 sm:$0xff]   ;;  %v1846_v18 = vld [vmem:[#allocation7 + $0x28] ss:$16 sps:$4 sm:$0xff]   ;;  %v1849_v19 = vld [vmem:[#allocation7 + $0x40] ss:$16 sps:$4 sm:$0xff]  }
  0x51   :  { %159 = vmatpush1.bf16.msra.mxu0 %v1830_v4  ;;  %200 = vmatpush1.bf16.msra.mxu1 %v1836_v9  ;;  %v1854_v20 = vld [vmem:[#allocation7 + $0x4c] ss:$16 sps:$4 sm:$0xff]   ;;  %v1857_v21 = vld [vmem:[#allocation7 + $0x64] ss:$16 sps:$4 sm:$0xff]   ;;  %v1852_v22 = vld [vmem:[#allocation7 + $0x48] ss:$16 sps:$4 sm:$0xff]  }
  0x52   :  { %1036 = vmatprep.subr.bf16.mxu0 %v1839_v10  ;;  %1118 = vmatprep.subr.bf16.mxu1 %v1842_v12  ;;  %v1855_v23 = vld [vmem:[#allocation7 + $0x60] ss:$16 sps:$4 sm:$0xff]   ;;  %v1860_v24 = vld [vmem:[#allocation7 + $0x6c] ss:$16 sps:$4 sm:$0xff]   ;;  %v1863_v25 = vld [vmem:[#allocation7 + $0x84] ss:$16 sps:$4 sm:$0xff]   ;;  %v92_v12 = vlaneseq }
  0x53   :  { %v1858_v26 = vld [vmem:[#allocation7 + $0x68] ss:$16 sps:$4 sm:$0xff]   ;;  %v1861_v27 = vld [vmem:[#allocation7 + $0x80] ss:$16 sps:$4 sm:$0xff]   ;;  %v1866_v28 = vld [vmem:[#allocation7 + $0x8c] ss:$16 sps:$4 sm:$0xff]  }
  0x54   :  { %1596 = vmatmul.mubr.msk.bf16.vlgmr.msra.gmra.mrb[0].mxu0 %vm152_vm0, %v81_v7  ;;  %1597 = vmatmul.mubr.msk.bf16.vlgmr.msra.gmra.mrb[0].mxu1 %vm152_vm0, %v81_v7  ;;  %v1869_v29 = vld [vmem:[#allocation7 + $0xa4] ss:$16 sps:$4 sm:$0xff]   ;;  %v1864_v30 = vld [vmem:[#allocation7 + $0x88] ss:$16 sps:$4 sm:$0xff]   ;;  %v1867_v31 = vld [vmem:[#allocation7 + $0xa0] ss:$16 sps:$4 sm:$0xff]  }
  0x55   :  { %1037 = vmatpush1.bf16.msra.mxu0 %v1837_v11  ;;  %1119 = vmatpush1.bf16.msra.mxu1 %v1840_v14  ;;  %v1872_v32 = vld [vmem:[#allocation7 + $0xac] ss:$16 sps:$4 sm:$0xff]   ;;  %v1875_v33 = vld [vmem:[#allocation7 + $0xc4] ss:$16 sps:$4 sm:$0xff]   ;;  %v1870_v34 = vld [vmem:[#allocation7 + $0xa8] ss:$16 sps:$4 sm:$0xff]  }
  0x56   :  { %1038 = vmatprep.subr.bf16.mxu0 %v1845_v13  ;;  %1120 = vmatprep.subr.bf16.mxu1 %v1848_v16  ;;  %v1873_v35 = vld [vmem:[#allocation7 + $0xc0] ss:$16 sps:$4 sm:$0xff]   ;;  %v1878_v36 = vld [vmem:[#allocation7 + $0xcc] ss:$16 sps:$4 sm:$0xff]   ;;  %v1881_v37 = vld [vmem:[#allocation7 + $0xe4] ss:$16 sps:$4 sm:$0xff]  }
  0x57   :  { %v1876_v38 = vld [vmem:[#allocation7 + $0xc8] ss:$16 sps:$4 sm:$0xff]   ;;  %v1879_v39 = vld [vmem:[#allocation7 + $0xe0] ss:$16 sps:$4 sm:$0xff]   ;;  %v1884_v40 = vld [vmem:[#allocation7 + $0xec] ss:$16 sps:$4 sm:$0xff]  }
  0x58   :  { %v1887_v41 = vld [vmem:[#allocation7 + $0x104] ss:$16 sps:$4 sm:$0xff]   ;;  %v1882_v42 = vld [vmem:[#allocation7 + $0xe8] ss:$16 sps:$4 sm:$0xff]   ;;  %v1885_v43 = vld [vmem:[#allocation7 + $0x100] ss:$16 sps:$4 sm:$0xff]  }
  0x59   :  { %1039 = vmatpush1.bf16.msra.mxu0 %v1843_v15  ;;  %1121 = vmatpush1.bf16.msra.mxu1 %v1846_v18  ;;  %v1890_v44 = vld [vmem:[#allocation7 + $0x10c] ss:$16 sps:$4 sm:$0xff]   ;;  %v1893_v45 = vld [vmem:[#allocation7 + $0x124] ss:$16 sps:$4 sm:$0xff]   ;;  %v1888_v46 = vld [vmem:[#allocation7 + $0x108] ss:$16 sps:$4 sm:$0xff]  }
  0x5a   :  { %1040 = vmatprep.subr.bf16.mxu0 %v1851_v17  ;;  %1122 = vmatprep.subr.bf16.mxu1 %v1854_v20  ;;  %v1891_v47 = vld [vmem:[#allocation7 + $0x120] ss:$16 sps:$4 sm:$0xff]   ;;  %v1896_v48 = vld [vmem:[#allocation7 + $0x12c] ss:$16 sps:$4 sm:$0xff]   ;;  %v1899_v49 = vld [vmem:[#allocation7 + $0x144] ss:$16 sps:$4 sm:$0xff]  }
  0x5b   :  { %v1894_v50 = vld [vmem:[#allocation7 + $0x128] ss:$16 sps:$4 sm:$0xff]   ;;  %v1897_v51 = vld [vmem:[#allocation7 + $0x140] ss:$16 sps:$4 sm:$0xff]   ;;  %v1902_v52 = vld [vmem:[#allocation7 + $0x14c] ss:$16 sps:$4 sm:$0xff]  }
  0x5c   :  { %v1905_v53 = vld [vmem:[#allocation7 + $0x164] ss:$16 sps:$4 sm:$0xff]   ;;  %v1900_v54 = vld [vmem:[#allocation7 + $0x148] ss:$16 sps:$4 sm:$0xff]   ;;  %v1903_v55 = vld [vmem:[#allocation7 + $0x160] ss:$16 sps:$4 sm:$0xff]  }
  0x5d   :  { %1041 = vmatpush1.bf16.msra.mxu0 %v1849_v19  ;;  %1123 = vmatpush1.bf16.msra.mxu1 %v1852_v22  ;;  %v1908_v56 = vld [vmem:[#allocation7 + $0x16c] ss:$16 sps:$4 sm:$0xff]   ;;  %v1911_v57 = vld [vmem:[#allocation7 + $0x184] ss:$16 sps:$4 sm:$0xff]   ;;  %v1906_v58 = vld [vmem:[#allocation7 + $0x168] ss:$16 sps:$4 sm:$0xff]  }
  0x5e   :  { %1042 = vmatprep.subr.bf16.mxu0 %v1857_v21  ;;  %1124 = vmatprep.subr.bf16.mxu1 %v1860_v24  ;;  %v1909_v59 = vld [vmem:[#allocation7 + $0x180] ss:$16 sps:$4 sm:$0xff]   ;;  %v1914_v60 = vld [vmem:[#allocation7 + $0x18c] ss:$16 sps:$4 sm:$0xff]   ;;  %v1917_v61 = vld [vmem:[#allocation7 + $0x1a4] ss:$16 sps:$4 sm:$0xff]  }
  0x5f   :  { %v1912_v62 = vld [vmem:[#allocation7 + $0x188] ss:$16 sps:$4 sm:$0xff]   ;;  %v1915_v63 = vld [vmem:[#allocation7 + $0x1a0] ss:$16 sps:$4 sm:$0xff]   ;;  %v1920_v0 = vld [vmem:[#allocation7 + $0x1ac] ss:$16 sps:$4 sm:$0xff]  }
  0x60   :  { %v1918_v1 = vld [vmem:[#allocation7 + $0x1a8] ss:$16 sps:$4 sm:$0xff]   ;;  %v1923_v2 = vld [vmem:[#allocation7 + $0x1c4] ss:$16 sps:$4 sm:$0xff]   ;;  %v1926_v3 = vld [vmem:[#allocation7 + $0x1cc] ss:$16 sps:$4 sm:$0xff]  }
  0x61   :  { %1043 = vmatpush1.bf16.msra.mxu0 %v1855_v23  ;;  %1125 = vmatpush1.bf16.msra.mxu1 %v1858_v26  ;;  %v1921_v4 = vld [vmem:[#allocation7 + $0x1c0] ss:$16 sps:$4 sm:$0xff]   ;;  %v1924_v5 = vld [vmem:[#allocation7 + $0x1c8] ss:$16 sps:$4 sm:$0xff]   ;;  %v1929_v6 = vld [vmem:[#allocation7 + $0x1e4] ss:$16 sps:$4 sm:$0xff]  }
  0x62   :  { %1044 = vmatprep.subr.bf16.mxu0 %v1863_v25  ;;  %1126 = vmatprep.subr.bf16.mxu1 %v1866_v28  ;;  %v1932_v7 = vld [vmem:[#allocation7 + $0x1ec] ss:$16 sps:$4 sm:$0xff]   ;;  %v1927_v8 = vld [vmem:[#allocation7 + $0x1e0] ss:$16 sps:$4 sm:$0xff]   ;;  %v1930_v9 = vld [vmem:[#allocation7 + $0x1e8] ss:$16 sps:$4 sm:$0xff]  }
  0x63   :  { %v1935_v10 = vld [vmem:[#allocation7 + $0x204] ss:$16 sps:$4 sm:$0xff]   ;;  %v1938_v11 = vld [vmem:[#allocation7 + $0x20c] ss:$16 sps:$4 sm:$0xff]   ;;  %v2288_v13 = vshrl.u32 %v92_v12, 7 }
  0x64   :  { %v2294_v15 = vld [vmem:[%s2343_s2] sm:$0xf] }
  0x65   :  { %1045 = vmatpush1.bf16.msra.mxu0 %v1861_v27  ;;  %1127 = vmatpush1.bf16.msra.mxu1 %v1864_v30  ;;  %v94_v14 = vsub.s32 0, %v2288_v13  ;;  %v98_v16 = vsub.s32 1, %v2288_v13  ;;  %v106_v18 = vsub.s32 3, %v2288_v13 }
  0x66   :  { %1046 = vmatprep.subr.bf16.mxu0 %v1869_v29  ;;  %1128 = vmatprep.subr.bf16.mxu1 %v1872_v32 }
  0x67   :  { %v95_v17 = vrot.slane %v2294_v15, %v94_v14  ;;  %v99_v19 = vrot.slane %v2294_v15, %v98_v16  ;;  %v107_v23 = vrot.slane %v2294_v15, %v106_v18 }
  0x69   :  { %1047 = vmatpush1.bf16.msra.mxu0 %v1867_v31  ;;  %1129 = vmatpush1.bf16.msra.mxu1 %v1870_v34  ;;  %v1933_v34 = vld [vmem:[#allocation7 + $0x200] ss:$16 sps:$4 sm:$0xff]  }
  0x6a   :  { %1048 = vmatprep.subr.bf16.mxu0 %v1875_v33  ;;  %1130 = vmatprep.subr.bf16.mxu1 %v1878_v36 }
  0x6d   :  { %1049 = vmatpush1.bf16.msra.mxu0 %v1873_v35  ;;  %1131 = vmatpush1.bf16.msra.mxu1 %v1876_v38  ;;  %v1936_v35 = vld [vmem:[#allocation7 + $0x208] ss:$16 sps:$4 sm:$0xff]   ;;  %v1941_v38 = vld [vmem:[#allocation7 + $0x224] ss:$16 sps:$4 sm:$0xff]  }
  0x6e   :  { %1050 = vmatprep.subr.bf16.mxu0 %v1881_v37  ;;  %1132 = vmatprep.subr.bf16.mxu1 %v1884_v40 }
  0x71   :  { %1051 = vmatpush1.bf16.msra.mxu0 %v1879_v39  ;;  %1133 = vmatpush1.bf16.msra.mxu1 %v1882_v42  ;;  %v1944_v39 = vld [vmem:[#allocation7 + $0x22c] ss:$16 sps:$4 sm:$0xff]   ;;  %v1939_v42 = vld [vmem:[#allocation7 + $0x220] ss:$16 sps:$4 sm:$0xff]  }
  0x72   :  { %1052 = vmatprep.subr.bf16.mxu0 %v1887_v41  ;;  %1134 = vmatprep.subr.bf16.mxu1 %v1890_v44  ;;  %v1947_v44 = vld [vmem:[#allocation7 + $0x244] ss:$16 sps:$4 sm:$0xff]  }
  0x75   :  { %1053 = vmatpush1.bf16.msra.mxu0 %v1885_v43  ;;  %1135 = vmatpush1.bf16.msra.mxu1 %v1888_v46  ;;  %v1942_v43 = vld [vmem:[#allocation7 + $0x228] ss:$16 sps:$4 sm:$0xff]   ;;  %v1945_v46 = vld [vmem:[#allocation7 + $0x240] ss:$16 sps:$4 sm:$0xff]  }
  0x76   :  { %1054 = vmatprep.subr.bf16.mxu0 %v1893_v45  ;;  %1136 = vmatprep.subr.bf16.mxu1 %v1896_v48  ;;  %v1950_v45 = vld [vmem:[#allocation7 + $0x24c] ss:$16 sps:$4 sm:$0xff]   ;;  %v1953_v48 = vld [vmem:[#allocation7 + $0x264] ss:$16 sps:$4 sm:$0xff]  }
  0x79   :  { %1055 = vmatpush1.bf16.msra.mxu0 %v1891_v47  ;;  %1137 = vmatpush1.bf16.msra.mxu1 %v1894_v50  ;;  %v1948_v47 = vld [vmem:[#allocation7 + $0x248] ss:$16 sps:$4 sm:$0xff]   ;;  %v1951_v50 = vld [vmem:[#allocation7 + $0x260] ss:$16 sps:$4 sm:$0xff]  }
  0x7a   :  { %1056 = vmatprep.subr.bf16.mxu0 %v1899_v49  ;;  %1138 = vmatprep.subr.bf16.mxu1 %v1902_v52  ;;  %v1956_v49 = vld [vmem:[#allocation7 + $0x26c] ss:$16 sps:$4 sm:$0xff]   ;;  %v1959_v52 = vld [vmem:[#allocation7 + $0x284] ss:$16 sps:$4 sm:$0xff]  }
  0x7d   :  { %1057 = vmatpush1.bf16.msra.mxu0 %v1897_v51  ;;  %1139 = vmatpush1.bf16.msra.mxu1 %v1900_v54  ;;  %v1954_v51 = vld [vmem:[#allocation7 + $0x268] ss:$16 sps:$4 sm:$0xff]   ;;  %v1957_v54 = vld [vmem:[#allocation7 + $0x280] ss:$16 sps:$4 sm:$0xff]  }
  0x7e   :  { %1058 = vmatprep.subr.bf16.mxu0 %v1905_v53  ;;  %1140 = vmatprep.subr.bf16.mxu1 %v1908_v56  ;;  %v1962_v53 = vld [vmem:[#allocation7 + $0x28c] ss:$16 sps:$4 sm:$0xff]   ;;  %v1965_v56 = vld [vmem:[#allocation7 + $0x2a4] ss:$16 sps:$4 sm:$0xff]  }
  0x81   :  { %1059 = vmatpush1.bf16.msra.mxu0 %v1903_v55  ;;  %1141 = vmatpush1.bf16.msra.mxu1 %v1906_v58  ;;  %v1960_v55 = vld [vmem:[#allocation7 + $0x288] ss:$16 sps:$4 sm:$0xff]   ;;  %v1963_v58 = vld [vmem:[#allocation7 + $0x2a0] ss:$16 sps:$4 sm:$0xff]  }
  0x82   :  { %1060 = vmatprep.subr.bf16.mxu0 %v1911_v57  ;;  %1142 = vmatprep.subr.bf16.mxu1 %v1914_v60  ;;  %v1968_v57 = vld [vmem:[#allocation7 + $0x2ac] ss:$16 sps:$4 sm:$0xff]   ;;  %v1971_v60 = vld [vmem:[#allocation7 + $0x2c4] ss:$16 sps:$4 sm:$0xff]  }
  0x85   :  { %1061 = vmatpush1.bf16.msra.mxu0 %v1909_v59  ;;  %1143 = vmatpush1.bf16.msra.mxu1 %v1912_v62  ;;  %v1966_v59 = vld [vmem:[#allocation7 + $0x2a8] ss:$16 sps:$4 sm:$0xff]   ;;  %v1969_v62 = vld [vmem:[#allocation7 + $0x2c0] ss:$16 sps:$4 sm:$0xff]  }
  0x86   :  { %1062 = vmatprep.subr.bf16.mxu0 %v1917_v61  ;;  %1144 = vmatprep.subr.bf16.mxu1 %v1920_v0  ;;  %v1974_v61 = vld [vmem:[#allocation7 + $0x2cc] ss:$16 sps:$4 sm:$0xff]   ;;  %v1977_v0 = vld [vmem:[#allocation7 + $0x2e4] ss:$16 sps:$4 sm:$0xff]  }
  0x89   :  { %1063 = vmatpush1.bf16.msra.mxu0 %v1915_v63  ;;  %1145 = vmatpush1.bf16.msra.mxu1 %v1918_v1  ;;  %v1972_v63 = vld [vmem:[#allocation7 + $0x2c8] ss:$16 sps:$4 sm:$0xff]   ;;  %v1980_v1 = vld [vmem:[#allocation7 + $0x2ec] ss:$16 sps:$4 sm:$0xff]  }
  0x8a   :  { %1064 = vmatprep.subr.bf16.mxu0 %v1923_v2  ;;  %1146 = vmatprep.subr.bf16.mxu1 %v1926_v3  ;;  %v1975_v2 = vld [vmem:[#allocation7 + $0x2e0] ss:$16 sps:$4 sm:$0xff]   ;;  %v1978_v3 = vld [vmem:[#allocation7 + $0x2e8] ss:$16 sps:$4 sm:$0xff]  }
  0x8d   :  { %1065 = vmatpush1.bf16.msra.mxu0 %v1921_v4  ;;  %1147 = vmatpush1.bf16.msra.mxu1 %v1924_v5  ;;  %v1983_v4 = vld [vmem:[#allocation7 + $0x304] ss:$16 sps:$4 sm:$0xff]   ;;  %v1986_v5 = vld [vmem:[#allocation7 + $0x30c] ss:$16 sps:$4 sm:$0xff]  }
  0x8e   :  { %1066 = vmatprep.subr.bf16.mxu0 %v1929_v6  ;;  %1148 = vmatprep.subr.bf16.mxu1 %v1932_v7  ;;  %v1981_v6 = vld [vmem:[#allocation7 + $0x300] ss:$16 sps:$4 sm:$0xff]   ;;  %v1984_v7 = vld [vmem:[#allocation7 + $0x308] ss:$16 sps:$4 sm:$0xff]  }
  0x91   :  { %1067 = vmatpush1.bf16.msra.mxu0 %v1927_v8  ;;  %1149 = vmatpush1.bf16.msra.mxu1 %v1930_v9  ;;  %v1989_v8 = vld [vmem:[#allocation7 + $0x324] ss:$16 sps:$4 sm:$0xff]   ;;  %v1992_v9 = vld [vmem:[#allocation7 + $0x32c] ss:$16 sps:$4 sm:$0xff]  }
  0x92   :  { %1077 = vmatprep.subr.bf16.mxu0 %v1935_v10  ;;  %1159 = vmatprep.subr.bf16.mxu1 %v1938_v11  ;;  %v1987_v10 = vld [vmem:[#allocation7 + $0x320] ss:$16 sps:$4 sm:$0xff]   ;;  %v1990_v11 = vld [vmem:[#allocation7 + $0x328] ss:$16 sps:$4 sm:$0xff]  }
 0x127   :  { %v190_v20 = vpop.f32.mrb[0].mxu0  ;;  %v2307_v28 = vpop.f32.mrb[0].mxu1 }
 0x128   :  { %v191_v21 = vadd.f32 %v190_v20, %v95_v17  ;;  %v192_v22 = vpop.f32.mrb[1].mxu0  ;;  %v233_v30 = vpop.f32.mrb[1].mxu1  ;;  %v1995_v17 = vld [vmem:[#allocation7 + $0x344] ss:$16 sps:$4 sm:$0xff]   ;;  %v1993_v20 = vld [vmem:[#allocation7 + $0x340] ss:$16 sps:$4 sm:$0xff]  }
 0x129   :  { %v193_v24 = vadd.f32 %v192_v22, %v99_v19  ;;  %v194_v25 = vpop.f32.mrb[2].mxu0  ;;  %v234_v31 = vadd.f32 %v233_v30, %v107_v23  ;;  %v235_v32 = vpop.f32.mrb[2].mxu1  ;;  %v1998_v19 = vld [vmem:[#allocation7 + $0x34c] ss:$16 sps:$4 sm:$0xff]   ;;  %v2001_v22 = vld [vmem:[#allocation7 + $0x364] ss:$16 sps:$4 sm:$0xff]  }
 0x12a   :  { %v238_v26 = vmax.f32 %v191_v21, 0.0  ;;  %v195_v27 = vpop.f32.mrb[3].mxu0  ;;  %v236_v36 = vpop.f32.mrb[3].mxu1  ;;  %v1996_v21 = vld [vmem:[#allocation7 + $0x348] ss:$16 sps:$4 sm:$0xff]  }
 0x12b   :  { %v239_v29 = vmax.f32 %v193_v24, 0.0  ;;  %v241_v40 = vmax.f32 %v234_v31, 0.0  ;;  %v2004_v23 = vld [vmem:[#allocation7 + $0x36c] ss:$16 sps:$4 sm:$0xff]   ;;  %v1999_v24 = vld [vmem:[#allocation7 + $0x360] ss:$16 sps:$4 sm:$0xff]  }
 0x12c   :  { %v242_v37 = vpack.c.bf16 %v238_v26, %v238_v26  ;;  %v2002_v25 = vld [vmem:[#allocation7 + $0x368] ss:$16 sps:$4 sm:$0xff]   ;;  %v2007_v26 = vld [vmem:[#allocation7 + $0x384] ss:$16 sps:$4 sm:$0xff]   ;;  %v2010_v27 = vld [vmem:[#allocation7 + $0x38c] ss:$16 sps:$4 sm:$0xff]  }
 0x12d   :  { %v243_v33 = vpack.c.bf16 %v239_v29, %v239_v29  ;;  %v245_v41 = vpack.c.bf16 %v241_v40, %v241_v40  ;;  %v2005_v29 = vld [vmem:[#allocation7 + $0x380] ss:$16 sps:$4 sm:$0xff]   ;;  %v2008_v30 = vld [vmem:[#allocation7 + $0x388] ss:$16 sps:$4 sm:$0xff]   ;;  %v102_v31 = vsub.s32 2, %v2288_v13 }
 0x12e   :  { %v2013_v32 = vld [vmem:[#allocation7 + $0x3a4] ss:$16 sps:$4 sm:$0xff]   ;;  %v2020_v40 = vld [vmem:[#allocation7 + $0x3c8] ss:$16 sps:$4 sm:$0xff]  }
 0x12f   :  { %1068 = vmatprep.mubr.bf16.mxu0 %v243_v33  ;;  %1150 = vmatprep.mubr.bf16.mxu1 %v243_v33  ;;  %v2016_v33 = vld [vmem:[#allocation7 + $0x3ac] ss:$16 sps:$4 sm:$0xff]   ;;  %v103_v36 = vrot.slane %v2294_v15, %v102_v31  ;;  %v2029_v15 = vld [vmem:[#allocation8 + $0x40] sm:$0xff]  }
 0x130   :  { %1069 = vmatmul.mubr.bf16.vlgmr.msra.gmra.mrb[4].mxu0 %v242_v37  ;;  %1151 = vmatmul.mubr.bf16.vlgmr.msra.gmra.mrb[4].mxu1 %v242_v37  ;;  %v2019_v37 = vld [vmem:[#allocation7 + $0x3c4] ss:$16 sps:$4 sm:$0xff]  }
 0x131   :  { %1078 = vmatpush1.bf16.msra.mxu0 %v1933_v34  ;;  %1160 = vmatpush1.bf16.msra.mxu1 %v1936_v35  ;;  %v2011_v34 = vld [vmem:[#allocation7 + $0x3a0] ss:$16 sps:$4 sm:$0xff]   ;;  %v2014_v35 = vld [vmem:[#allocation7 + $0x3a8] ss:$16 sps:$4 sm:$0xff]  }
 0x132   :  { %1079 = vmatprep.subr.bf16.mxu0 %v1941_v38  ;;  %1161 = vmatprep.subr.bf16.mxu1 %v1944_v39  ;;  %v2022_v38 = vld [vmem:[#allocation7 + $0x3cc] ss:$16 sps:$4 sm:$0xff]   ;;  %v2017_v39 = vld [vmem:[#allocation7 + $0x3c0] ss:$16 sps:$4 sm:$0xff]  }
 0x133   :  { %1109 = vmatprep.mubr.bf16.mxu0 %v245_v41  ;;  %1191 = vmatprep.mubr.bf16.mxu1 %v245_v41  ;;  %v232_v41 = vadd.f32 %v2307_v28, %v103_v36  ;;  %v2033_v28 = vld [vmem:[#allocation8 + $0x48] sm:$0xff]  }
 0x135   :  { %1080 = vmatpush1.bf16.msra.mxu0 %v1939_v42  ;;  %1162 = vmatpush1.bf16.msra.mxu1 %v1942_v43  ;;  %v2025_v42 = vld [vmem:[#allocation7 + $0x3e4] ss:$16 sps:$4 sm:$0xff]   ;;  %v2028_v43 = vld [vmem:[#allocation7 + $0x3ec] ss:$16 sps:$4 sm:$0xff]  }
 0x136   :  { %1081 = vmatprep.subr.bf16.mxu0 %v1947_v44  ;;  %1163 = vmatprep.subr.bf16.mxu1 %v1950_v45  ;;  %v2023_v44 = vld [vmem:[#allocation7 + $0x3e0] ss:$16 sps:$4 sm:$0xff]   ;;  %v2026_v45 = vld [vmem:[#allocation7 + $0x3e8] ss:$16 sps:$4 sm:$0xff]  }
 0x139   :  { %1082 = vmatpush1.bf16.msra.mxu0 %v1945_v46  ;;  %1164 = vmatpush1.bf16.msra.mxu1 %v1948_v47  ;;  %v240_v46 = vmax.f32 %v232_v41, 0.0  ;;  %v2030_v47 = vld [vmem:[#allocation8 + $0xc0] sm:$0xff]  }
 0x13a   :  { %1083 = vmatprep.subr.bf16.mxu0 %v1953_v48  ;;  %1165 = vmatprep.subr.bf16.mxu1 %v1956_v49  ;;  %v2031_v48 = vld [vmem:[#allocation8] sm:$0xff]  }
 0x13b   :  { %v2032_v49 = vld [vmem:[#allocation8 + $0x80] sm:$0xff]  }
 0x13d   :  { %1084 = vmatpush1.bf16.msra.mxu0 %v1951_v50  ;;  %1166 = vmatpush1.bf16.msra.mxu1 %v1954_v51  ;;  %v244_v50 = vpack.c.bf16 %v240_v46, %v240_v46  ;;  %v2034_v51 = vld [vmem:[#allocation8 + $0xc8] sm:$0xff]  }
 0x13e   :  { %1085 = vmatprep.subr.bf16.mxu0 %v1959_v52  ;;  %1167 = vmatprep.subr.bf16.mxu1 %v1962_v53  ;;  %v2035_v52 = vld [vmem:[#allocation8 + $0x8] sm:$0xff]  }
 0x13f   :  { %v2036_v53 = vld [vmem:[#allocation8 + $0x88] sm:$0xff]  }
 0x141   :  { %1086 = vmatpush1.bf16.msra.mxu0 %v1957_v54  ;;  %1168 = vmatpush1.bf16.msra.mxu1 %v1960_v55  ;;  %v2037_v54 = vld [vmem:[#allocation8 + $0x50] sm:$0xff]  }
 0x142   :  { %1087 = vmatprep.subr.bf16.mxu0 %v1965_v56  ;;  %1169 = vmatprep.subr.bf16.mxu1 %v1968_v57  ;;  %v2038_v55 = vld [vmem:[#allocation8 + $0xd0] sm:$0xff]  }
 0x143   :  { %v2039_v56 = vld [vmem:[#allocation8 + $0x10] sm:$0xff]  }
 0x144   :  { %v2040_v57 = vld [vmem:[#allocation8 + $0x90] sm:$0xff]  }
 0x145   :  { %1088 = vmatpush1.bf16.msra.mxu0 %v1963_v58  ;;  %1170 = vmatpush1.bf16.msra.mxu1 %v1966_v59  ;;  %v2041_v58 = vld [vmem:[#allocation8 + $0x58] sm:$0xff]  }
 0x146   :  { %1089 = vmatprep.subr.bf16.mxu0 %v1971_v60  ;;  %1171 = vmatprep.subr.bf16.mxu1 %v1974_v61  ;;  %v2042_v59 = vld [vmem:[#allocation8 + $0xd8] sm:$0xff]  }
 0x147   :  { %v2043_v60 = vld [vmem:[#allocation8 + $0x18] sm:$0xff]  }
 0x148   :  { %v2044_v61 = vld [vmem:[#allocation8 + $0x98] sm:$0xff]  }
 0x149   :  { %1090 = vmatpush1.bf16.msra.mxu0 %v1969_v62  ;;  %1172 = vmatpush1.bf16.msra.mxu1 %v1972_v63  ;;  %v2045_v62 = vld [vmem:[#allocation8 + $0x60] sm:$0xff]  }
 0x14a   :  { %1091 = vmatprep.subr.bf16.mxu0 %v1977_v0  ;;  %1173 = vmatprep.subr.bf16.mxu1 %v1980_v1  ;;  %v2046_v63 = vld [vmem:[#allocation8 + $0xe0] sm:$0xff]  }
 0x14b   :  { %v2047_v0 = vld [vmem:[#allocation8 + $0x20] sm:$0xff]  }
 0x14c   :  { %v2048_v1 = vld [vmem:[#allocation8 + $0xa0] sm:$0xff]  }
 0x14d   :  { %1092 = vmatpush1.bf16.msra.mxu0 %v1975_v2  ;;  %1174 = vmatpush1.bf16.msra.mxu1 %v1978_v3  ;;  %v2049_v2 = vld [vmem:[#allocation8 + $0x68] sm:$0xff]  }
 0x14e   :  { %1093 = vmatprep.subr.bf16.mxu0 %v1983_v4  ;;  %1175 = vmatprep.subr.bf16.mxu1 %v1986_v5  ;;  %v2050_v3 = vld [vmem:[#allocation8 + $0xe8] sm:$0xff]  }
 0x14f   :  { %v2051_v4 = vld [vmem:[#allocation8 + $0x28] sm:$0xff]  }
 0x150   :  { %v2052_v5 = vld [vmem:[#allocation8 + $0xa8] sm:$0xff]  }
 0x151   :  { %1094 = vmatpush1.bf16.msra.mxu0 %v1981_v6  ;;  %1176 = vmatpush1.bf16.msra.mxu1 %v1984_v7  ;;  %v2053_v6 = vld [vmem:[#allocation8 + $0x70] sm:$0xff]  }
 0x152   :  { %1095 = vmatprep.subr.bf16.mxu0 %v1989_v8  ;;  %1177 = vmatprep.subr.bf16.mxu1 %v1992_v9  ;;  %v2054_v7 = vld [vmem:[#allocation8 + $0xf0] sm:$0xff]  }
 0x153   :  { %v2055_v8 = vld [vmem:[#allocation8 + $0x30] sm:$0xff]  }
 0x154   :  { %v2056_v9 = vld [vmem:[#allocation8 + $0xb0] sm:$0xff]  }
 0x155   :  { %1096 = vmatpush1.bf16.msra.mxu0 %v1987_v10  ;;  %1178 = vmatpush1.bf16.msra.mxu1 %v1990_v11  ;;  %v2057_v10 = vld [vmem:[#allocation8 + $0x78] sm:$0xff]  }
 0x156   :  { %1097 = vmatprep.subr.bf16.mxu0 %v1995_v17  ;;  %1179 = vmatprep.subr.bf16.mxu1 %v1998_v19  ;;  %v2058_v11 = vld [vmem:[#allocation8 + $0xf8] sm:$0xff]  }
 0x157   :  { %v2059_v17 = vld [vmem:[#allocation8 + $0x38] sm:$0xff]  }
 0x158   :  { %v2060_v19 = vld [vmem:[#allocation8 + $0xb8] sm:$0xff]  }
 0x159   :  { %1098 = vmatpush1.bf16.msra.mxu0 %v1993_v20  ;;  %1180 = vmatpush1.bf16.msra.mxu1 %v1996_v21  ;;  %v374_v20 = vld [vmem:[%s2345_s4] sm:$0xf] }
 0x15a   :  { %1099 = vmatprep.subr.bf16.mxu0 %v2001_v22  ;;  %1181 = vmatprep.subr.bf16.mxu1 %v2004_v23  ;;  %v379_v21 = vrot.slane %v374_v20, %v94_v14  ;;  %v387_v22 = vrot.slane %v374_v20, %v102_v31  ;;  %v383_v23 = vrot.slane %v374_v20, %v98_v16 }
 0x15d   :  { %1100 = vmatpush1.bf16.msra.mxu0 %v1999_v24  ;;  %1182 = vmatpush1.bf16.msra.mxu1 %v2002_v25  ;;  %v391_v24 = vrot.slane %v374_v20, %v106_v18 }
 0x15e   :  { %1101 = vmatprep.subr.bf16.mxu0 %v2007_v26  ;;  %1183 = vmatprep.subr.bf16.mxu1 %v2010_v27 }
 0x161   :  { %1102 = vmatpush1.bf16.msra.mxu0 %v2005_v29  ;;  %1184 = vmatpush1.bf16.msra.mxu1 %v2008_v30 }
 0x162   :  { %1103 = vmatprep.subr.bf16.mxu0 %v2013_v32  ;;  %1185 = vmatprep.subr.bf16.mxu1 %v2016_v33 }
 0x165   :  { %1104 = vmatpush1.bf16.msra.mxu0 %v2011_v34  ;;  %1186 = vmatpush1.bf16.msra.mxu1 %v2014_v35 }
 0x166   :  { %1105 = vmatprep.subr.bf16.mxu0 %v2019_v37  ;;  %1187 = vmatprep.subr.bf16.mxu1 %v2022_v38 }
 0x169   :  { %1106 = vmatpush1.bf16.msra.mxu0 %v2017_v39  ;;  %1188 = vmatpush1.bf16.msra.mxu1 %v2020_v40 }
 0x16a   :  { %1107 = vmatprep.subr.bf16.mxu0 %v2025_v42  ;;  %1189 = vmatprep.subr.bf16.mxu1 %v2028_v43 }
 0x16d   :  { %1108 = vmatpush1.bf16.msra.mxu0 %v2023_v44  ;;  %1190 = vmatpush1.bf16.msra.mxu1 %v2026_v45  ;;  %v1726_v44 = vld [vmem:[%s2347_s6] ss:$0 sm:$0xff]  ;;  %s2192_s6 = smov [#allocation10]  }
 0x16e   :  { %1759 = vmatprep.subr.bf16.mxu0 %v2029_v15  ;;  %1781 = vmatprep.subr.bf16.mxu1 %v2030_v47  ;;  %s1577_s29 = sshll.u32 %s2192_s6, 4  ;;  %s1578_s29 = int_to_ptr.vmem [resolvable:$true] %s1577_s29 }
 0x16f   :  { %s2153_s30 = scalar_lea.vmem %s1578_s29, 128  ;;  %p2158_p5 = scmp.lt.s32.totalorder %s1578_s29, %s1578_s29 }
 0x170   :  { %1110 = vmatmul.mubr.bf16.vlgmr.msra.gmra.mrb[4].mxu0 %v244_v50  ;;  %1192 = vmatmul.mubr.bf16.vlgmr.msra.gmra.mrb[4].mxu1 %v244_v50  ;;  %p2154_p4 = scmp.ne.s32.totalorder %s1578_s29, %s2153_s30  ;;  %p2159_p6 = scmp.lt.s32.totalorder %s2153_s30, %s2153_s30 }
 0x171   :  { %1760 = vmatpush3.bf16.msra.mxu0 %v2031_v48  ;;  %1782 = vmatpush3.bf16.msra.mxu1 %v2032_v49 }
 0x172   :  { %1761 = vmatprep.subr.bf16.mxu0 %v2033_v28  ;;  %1783 = vmatprep.subr.bf16.mxu1 %v2034_v51  ;;  %p2160_p7 = por %p2159_p6, %p2158_p5 }
 0x174   :  { %p2161_p8 = pnand %p2160_p7, %p2154_p4 }
 0x175   :  { %1762 = vmatpush3.bf16.msra.mxu0 %v2035_v52  ;;  %1784 = vmatpush3.bf16.msra.mxu1 %v2036_v53 }
 0x176   :  { %1763 = vmatprep.subr.bf16.mxu0 %v2037_v54  ;;  %1785 = vmatprep.subr.bf16.mxu1 %v2038_v55 }
 0x179   :  { %1764 = vmatpush3.bf16.msra.mxu0 %v2039_v56  ;;  %1786 = vmatpush3.bf16.msra.mxu1 %v2040_v57 }
 0x17a   :  { %1765 = vmatprep.subr.bf16.mxu0 %v2041_v58  ;;  %1787 = vmatprep.subr.bf16.mxu1 %v2042_v59 }
 0x17d   :  { %1766 = vmatpush3.bf16.msra.mxu0 %v2043_v60  ;;  %1788 = vmatpush3.bf16.msra.mxu1 %v2044_v61  ;;  %v1552_v61 = vand.u32 127, %v92_v12 }
 0x17e   :  { %1767 = vmatprep.subr.bf16.mxu0 %v2045_v62  ;;  %1789 = vmatprep.subr.bf16.mxu1 %v2046_v63 }
 0x17f   :  { %vm1553_vm2 = vcmp.lt.s32.totalorder %v1552_v61, 8 }
 0x181   :  { %1768 = vmatpush3.bf16.msra.mxu0 %v2047_v0  ;;  %1790 = vmatpush3.bf16.msra.mxu1 %v2048_v1 }
 0x182   :  { %1769 = vmatprep.subr.bf16.mxu0 %v2049_v2  ;;  %1791 = vmatprep.subr.bf16.mxu1 %v2050_v3 }
 0x185   :  { %1770 = vmatpush3.bf16.msra.mxu0 %v2051_v4  ;;  %1792 = vmatpush3.bf16.msra.mxu1 %v2052_v5 }
 0x186   :  { %1771 = vmatprep.subr.bf16.mxu0 %v2053_v6  ;;  %1793 = vmatprep.subr.bf16.mxu1 %v2054_v7 }
 0x189   :  { %1772 = vmatpush3.bf16.msra.mxu0 %v2055_v8  ;;  %1794 = vmatpush3.bf16.msra.mxu1 %v2056_v9 }
 0x18a   :  { %1773 = vmatprep.subr.bf16.mxu0 %v2057_v10  ;;  %1795 = vmatprep.subr.bf16.mxu1 %v2058_v11 }
 0x18d   :  { %1774 = vmatpush3.bf16.msra.mxu0 %v2059_v17  ;;  %1796 = vmatpush3.bf16.msra.mxu1 %v2060_v19 }
 0x243   :  { %v1111_v25 = vpop.f32.mrb[4].mxu0  ;;  %v1193_v26 = vpop.f32.mrb[4].mxu1 }
 0x244   :  { %v1803_v27 = vadd.f32 %v1111_v25, %v379_v21  ;;  %v1805_v29 = vadd.f32 %v1193_v26, %v387_v22  ;;  %v1113_v30 = vpop.f32.mrb[5].mxu0  ;;  %v1195_v32 = vpop.f32.mrb[5].mxu1 }
 0x245   :  { %v1804_v33 = vadd.f32 %v1113_v30, %v383_v23  ;;  %v1806_v34 = vadd.f32 %v1195_v32, %v391_v24  ;;  %v1115_v35 = vpop.f32.mrb[6].mxu0  ;;  %v1197_v36 = vpop.f32.mrb[6].mxu1 }
 0x246   :  { %v1200_v14 = vmax.f32 %v1803_v27, 0.0  ;;  %v1202_v37 = vmax.f32 %v1805_v29, 0.0  ;;  %v1116_v38 = vpop.f32.mrb[7].mxu0  ;;  %v1198_v31 = vpop.f32.mrb[7].mxu1 }
 0x247   :  { %v1201_v39 = vmax.f32 %v1804_v33, 0.0  ;;  %v1203_v40 = vmax.f32 %v1806_v34, 0.0 }
 0x248   :  { %v1204_v13 = vpack.c.bf16 %v1200_v14, %v1200_v14  ;;  %v1206_v18 = vpack.c.bf16 %v1202_v37, %v1202_v37 }
 0x249   :  { %v1205_v16 = vpack.c.bf16 %v1201_v39, %v1201_v39  ;;  %v1207_v41 = vpack.c.bf16 %v1203_v40, %v1203_v40 }
 0x24b   :  { %1503 = vmatprep.mubr.bf16.mxu0 %v1205_v16  ;;  %1543 = vmatprep.mubr.bf16.mxu1 %v1207_v41 }
 0x24c   :  { %1504 = vmatmul.mubr.bf16.vlgmr.msra.gmra.mrb[8].mxu0 %v1204_v13  ;;  %1544 = vmatmul.mubr.bf16.vlgmr.msra.gmra.mrb[8].mxu1 %v1206_v18 }
 0x31f   :  { %v1775_v42 = vpop.f32.mrb[8].mxu0  ;;  %v1797_v43 = vpop.f32.mrb[8].mxu1 }
 0x320   :  { %v1776_v45 = vpop.f32.mrb[9].mxu0  ;;  %v1798_v46 = vpop.f32.mrb[9].mxu1 }
 0x321   :  { %v1777_v15 = vadd.f32 %v1776_v45, %v1775_v42  ;;  %v1799_v47 = vadd.f32 %v1798_v46, %v1797_v43  ;;  %v1778_v48 = vpop.f32.mrb[10].mxu0  ;;  %v1800_v49 = vpop.f32.mrb[10].mxu1 }
 0x322   :  { %v1779_v50 = vpop.f32.mrb[11].mxu0  ;;  %v1801_v28 = vpop.f32.mrb[11].mxu1 }
 0x323   :  { %v1506_v51 = vadd.f32 %v1777_v15, %v1726_v44 }
 0x325   :  { %v1546_v52 = vadd.f32 %v1799_v47, %v1506_v51 }
 0x327   :  { %v1555_v53 = vand.u32 2147483647, %v1546_v52  ;;  %v1554_v1 = vmax.f32 %v1546_v52, 0.0 }
 0x329   :  { %v1556_v54 = vsub.f32 0.0, %v1555_v53 }
 0x32b   :  { %v1557_v55 = vmul.f32 1.442695, %v1556_v54 }
 0x32d   :  { %2061 = vpow2.f32 %v1557_v55 }
 0x337   :  { %v2062_v56 = vpop.eup %2061 }
 0x338   :  { %v1559_v57 = vadd.f32 1.0, %v2062_v56  ;;  %v1562_v58 = vmul.f32 -0.5, %v2062_v56  ;;  %v1565_v60 = vand.u32 2147483647, %v2062_v56 }
 0x33a   :  { %2063 = vlog2.f32 %v1559_v57  ;;  %v1563_v59 = vadd.f32 1.0, %v1562_v58  ;;  %vm1566_vm1 = vcmp.lt.f32.partialorder %v1565_v60, 0.0004427343 }
 0x33c   :  { %v1564_v0 = vmul.f32 %v2062_v56, %v1563_v59 }
 0x344   :  { %v2064_v62 = vpop.eup %2063 }
 0x345   :  { %v1561_v63 = vmul.f32 0.6931472, %v2064_v62 }
 0x347   :  { %v1567_v2 = vsel %vm1566_vm1, %v1564_v0, %v1561_v63 }
 0x348   :  { %v1568_v3 = vadd.f32 %v1567_v2, %v1554_v1 }
 0x34a   :  { %v1569_v4 = vsel %vm1553_vm2, %v1546_v52, %v1568_v3 }
 0x34b   :  { %1570 = vst [vmem:[#allocation10] sm:$0xff] %v1569_v4 }
 0x34c   :  { %2164 = shalt.err (!%p2161_p8)
}
 0x34d   :  { %s2165_s10 = scalar_lea.hbm %s2348_s7, 128 }
 0x34e   :  { %p2166_p9 = scmp.ne.s32.totalorder %s2348_s7, %s2165_s10  ;;  %p2169_p10 = scmp.lt.u32.totalorder %s2165_s10, %s2348_s7 }
 0x350   :  { %p2171_p11 = pnand %p2169_p10, %p2166_p9 }
 0x352   :  { %2174 = shalt.err (!%p2171_p11)
}
 0x353   :  { %1580 = dma.vmem_to_hbm [thread:$0]  %s1578_s29, 128, %s2348_s7, [#allocation4]  }
 0x354   :  { %2181 = dma.done.wait [#allocation4], 128  }
 0x355   :  { %2182 = vsyncadd [#allocation4], 4294967168 }
 0x356   :  { %1584 = vsyncpa [#allocation3], 1 }
 0x357   :  { %1585 = vsyncpa [#allocation6], 1 }
 0x358   :  { %1586 = vsyncpa [#allocation9], 1 }
 0x359   :  { %1587 = vsyncpa [#allocation4], 1 }

</bundles_post_ra>
